<compile_context>
chip_gen: v5e
topology: v5e:2x2
jax: 0.10.0
libtpu: 0.0.40
codegen_flags: <defaults>
</compile_context>

<pallas_src>
import functools
import math

import jax
import jax.numpy as jnp
from jax.experimental import pallas as pl
from jax.experimental.pallas import tpu as pltpu


def _round_up(x, m):
    return (x + m - 1) // m * m


def _sublane(dtype):
    # 8 rows of 32-bit per sublane tile; narrower dtypes pack 2x/4x rows.
    return max(8, 32 // jnp.dtype(dtype).itemsize)


def _pick_tile_v(v_pad, limit):
    """Largest multiple of 128 that divides v_pad and is <= limit."""
    t = max(128, min((limit // 128) * 128, v_pad))
    while t > 128 and v_pad % t != 0:
        t -= 128
    return t


def lm_head_kernel(x_ref, w1_ref, b1_ref, g_ref, beta_ref, w2_ref, b2_ref,
                   out_ref, h_scr, *, eps):
    """Fused transform (dense + gelu + layernorm) and decoder matmul.

    grid = (token_tiles, vocab_tiles).  The transform depends only on the
    token tile, so it is computed once per token tile (at vocab tile 0) and
    cached in VMEM scratch; every vocab tile then runs the (tm, H) x (H, tv)
    MXU matmul plus bias.  Vocab axis must stay "arbitrary" (sequential) so
    the cached transform is valid for all j.
    """
    j = pl.program_id(1)

    @pl.when(j == 0)
    def _():
        # dense: operands at stored dtype (bf16 path -> native MXU), f32 acc.
        h = jnp.dot(x_ref[...], w1_ref[...],
                    preferred_element_type=jnp.float32)
        h = h + b1_ref[...].astype(jnp.float32)
        # exact gelu: x * 0.5 * (1 + erf(x / sqrt(2)))
        h = h * 0.5 * (1.0 + jax.lax.erf(h * (1.0 / math.sqrt(2.0))))
        # LayerNorm over hidden axis (biased variance, like torch LayerNorm).
        # Note: zero-padded token rows still produce finite values here
        # (variance of gelu(bias) is generally nonzero; even if it were zero,
        # (h - mu) == 0 so rsqrt(eps) is multiplied by 0) and are sliced off
        # by the wrapper — do not "fix" this into a NaN guard.
        mu = jnp.mean(h, axis=-1, keepdims=True)
        var = jnp.mean((h - mu) * (h - mu), axis=-1, keepdims=True)
        h = (h - mu) * jax.lax.rsqrt(var + eps)
        h = h * g_ref[...].astype(jnp.float32) + beta_ref[...].astype(jnp.float32)
        h_scr[...] = h.astype(h_scr.dtype)

    # decoder: (tm, H) @ (H, tv) + (1, tv), f32 accumulation on the MXU.
    out_ref[...] = (jnp.dot(h_scr[...], w2_ref[...],
                            preferred_element_type=jnp.float32)
                    + b2_ref[...].astype(jnp.float32)).astype(out_ref.dtype)


def prepare_lm_head_params(params, *, compute_dtype=None, vocab_align=256):
    """One-time parameter prep (keep OUT of the per-step hot path).

    - reshapes biases / LN params to (1, ·)
    - pads the decoder weight & bias vocab axis to a multiple of `vocab_align`
      (padded columns are zero => padded logits are exactly 0)
    - optionally casts the two matmul weights to `compute_dtype` (e.g. bf16)
      so the decoder-weight HBM stream is halved and the MXU runs its native
      narrow path; LN params and biases stay in their original dtype (the
      kernel promotes them to f32).
    """
    w1 = params["dense_w"]
    w2 = params["decoder_w"]
    if compute_dtype is not None:
        w1 = w1.astype(compute_dtype)
        w2 = w2.astype(compute_dtype)
    V = w2.shape[1]
    V_pad = _round_up(V, vocab_align)
    b2 = params["decoder_b"].reshape(1, -1)
    if V_pad != V:
        w2 = jnp.pad(w2, ((0, 0), (0, V_pad - V)))
        b2 = jnp.pad(b2, ((0, 0), (0, V_pad - V)))
    return {
        "dense_w": w1,
        "dense_b": params["dense_b"].reshape(1, -1),
        "ln_g": params["ln_g"].reshape(1, -1),
        "ln_b": params["ln_b"].reshape(1, -1),
        "decoder_w": w2,
        "decoder_b": b2,
        "vocab_size": int(V),
        "compute_dtype": compute_dtype,
    }


def bert_lm_prediction_head(hidden_states, prepared, *, eps=1e-12,
                            tm=1024, tv=2048, out_dtype=None, unpad=True):
    """Fused BertLMPredictionHead forward.

    tm: token tile (rows of B*S).  tv: vocab tile (multiple of 128; 256-multiple
    preferred on v6e/v7x).  Both are clamped to the problem size and to the
    queried VMEM capacity.  out_dtype lets callers request bf16 logits.
    """
    B, S, H = hidden_states.shape
    x = hidden_states.reshape(B * S, H)
    M = x.shape[0]

    compute_dtype = prepared.get("compute_dtype", None)
    if compute_dtype is not None and x.dtype != jnp.dtype(compute_dtype):
        x = x.astype(compute_dtype)

    w1 = prepared["dense_w"]
    b1 = prepared["dense_b"]
    g = prepared["ln_g"]
    beta = prepared["ln_b"]
    w2 = prepared["decoder_w"]
    b2 = prepared["decoder_b"]
    V = prepared["vocab_size"]
    V_pad = w2.shape[1]

    out_dtype = hidden_states.dtype if out_dtype is None else jnp.dtype(out_dtype)

    # Transform scratch (post-LayerNorm activations) follows the decoder
    # weight dtype so the big matmul runs on the narrow MXU path — but only
    # for floating dtypes (int8/fp8 weights would need an explicit scale).
    scr_dtype = w2.dtype if jnp.issubdtype(w2.dtype, jnp.floating) else jnp.float32

    # ---- tile selection -----------------------------------------------------
    sub = _sublane(x.dtype)
    tm_full = _round_up(M, sub)
    tm_eff = max(sub, min(_round_up(tm, sub), tm_full))
    if tm_eff >= tm_full and tm_full >= 2 * sub:
        # Guarantee >= 2 token tiles so the "parallel" axis can shard across
        # v7x's 2 TensorCores (no effect on 1-TC v5e/v6e beyond tile size).
        tm_eff = max(sub, _round_up((tm_full + 1) // 2, sub))

    tv_eff = _pick_tile_v(V_pad, tv)

    def _itemsize(dt):
        return jnp.dtype(dt).itemsize

    x_b, w1_b, w2_b = _itemsize(x.dtype), _itemsize(w1.dtype), _itemsize(w2.dtype)
    out_b, scr_b = _itemsize(out_dtype), _itemsize(scr_dtype)

    def _vmem_est(tm_, tv_):
        return (2 * tm_ * H * x_b          # x tile (double buffered)
                + 2 * H * H * w1_b          # dense weight
                + 2 * H * tv_ * w2_b        # decoder weight tile
                + 2 * tm_ * tv_ * out_b     # output tile
                + tm_ * H * scr_b           # transform scratch
                + 8 * (3 * H + tv_) * 4     # small (1, ·) vectors, sublane-padded
                + (1 << 20))                # fudge for compiler-internal scratch

    try:
        vmem_cap = int(pltpu.get_tpu_info().vmem_capacity_bytes)
    except Exception:
        vmem_cap = 64 * 1024 * 1024  # conservative: v7x per-TensorCore VMEM

    budget = int(vmem_cap * 0.85)
    while _vmem_est(tm_eff, tv_eff) > budget:
        if tv_eff > 512:
            tv_eff = _pick_tile_v(V_pad, tv_eff // 2)   # shrink tv first
        elif tm_eff > sub:
            tm_eff = max(sub, _round_up(tm_eff // 2, sub))
        else:
            break

    est = _vmem_est(tm_eff, tv_eff)
    vmem_limit = int(min(max(32 << 20, int(1.25 * est) + (2 << 20)),
                         vmem_cap - (2 << 20)))

    # ---- row padding (cheap: (M, H) stream, not the (M, V) logits) ----------
    M_pad = _round_up(M, tm_eff)
    if M_pad != M:
        x = jnp.pad(x, ((0, M_pad - M), (0, 0)))

    grid = (M_pad // tm_eff, V_pad // tv_eff)
    out = pl.pallas_call(
        functools.partial(lm_head_kernel, eps=eps),
        out_shape=jax.ShapeDtypeStruct((M_pad, V_pad), out_dtype),
        grid_spec=pltpu.PrefetchScalarGridSpec(
            num_scalar_prefetch=0,
            grid=grid,
            in_specs=[
                pl.BlockSpec((tm_eff, H), lambda i, j: (i, 0)),   # x rows
                pl.BlockSpec((H, H), lambda i, j: (0, 0)),        # dense weight
                pl.BlockSpec((1, H), lambda i, j: (0, 0)),        # dense bias
                pl.BlockSpec((1, H), lambda i, j: (0, 0)),        # LN gamma
                pl.BlockSpec((1, H), lambda i, j: (0, 0)),        # LN beta
                pl.BlockSpec((H, tv_eff), lambda i, j: (0, j)),   # decoder weight tile
                pl.BlockSpec((1, tv_eff), lambda i, j: (0, j)),   # decoder bias tile
            ],
            out_specs=pl.BlockSpec((tm_eff, tv_eff), lambda i, j: (i, j)),
            scratch_shapes=[pltpu.VMEM((tm_eff, H), scr_dtype)],
        ),
        compiler_params=pltpu.CompilerParams(
            # vocab axis must stay "arbitrary": the transform cached at j==0
            # is reused by every vocab tile of the same token tile.
            dimension_semantics=("parallel", "arbitrary"),
            vmem_limit_bytes=vmem_limit),
    )(x, w1, b1, g, beta, w2, b2)

    if unpad:
        out = out[:M, :V]
        return out.reshape(B, S, V)
    return out.reshape(B, S, V_pad)[:, :, :]  # padded vocab cols are exact zeros


def reference(hidden_states, params, *, eps=1e-12):
    hi = jax.lax.Precision.HIGHEST
    x = hidden_states.astype(jnp.float32)
    h = jnp.dot(x, params["dense_w"].astype(jnp.float32), precision=hi) + params["dense_b"]
    h = h * 0.5 * (1.0 + jax.lax.erf(h / jnp.sqrt(2.0)))
    mu = jnp.mean(h, axis=-1, keepdims=True)
    var = jnp.mean((h - mu) ** 2, axis=-1, keepdims=True)
    h = (h - mu) / jnp.sqrt(var + eps)
    h = h * params["ln_g"] + params["ln_b"]
    return jnp.dot(h, params["decoder_w"].astype(jnp.float32), precision=hi) + params["decoder_b"]


if __name__ == "__main__":
    # Small config: batch=2, seq=8, hidden=32, vocab=250 (not a multiple of
    # 128, exercises the vocab-padding path in prepare_lm_head_params).
    B, S, H, V = 2, 8, 32, 250
    key = jax.random.PRNGKey(0)
    kx, kw1, kb1, kg, kbt, kw2 = jax.random.split(key, 6)

    hidden_states = jax.random.normal(kx, (B, S, H), dtype=jnp.float32)
    params = {
        # stored (in, out) == transpose of torch nn.Linear.weight
        "dense_w": jax.random.normal(kw1, (H, H), jnp.float32) * 0.05,
        "dense_b": jax.random.normal(kb1, (1, H), jnp.float32) * 0.02,
        "ln_g": 1.0 + 0.1 * jax.random.normal(kg, (1, H), jnp.float32),
        "ln_b": 0.1 * jax.random.normal(kbt, (1, H), jnp.float32),
        "decoder_w": jax.random.normal(kw2, (H, V), jnp.float32) * 0.05,
        "decoder_b": jnp.zeros((1, V), jnp.float32),  # nn.Parameter(torch.zeros(V))
    }

    ref = reference(hidden_states, params)

    # f32 path: tight numeric check against the PyTorch-equivalent reference.
    prep32 = prepare_lm_head_params(params)
    out32 = bert_lm_prediction_head(hidden_states, prep32)
    jax.block_until_ready(out32)
    assert out32.shape == (B, S, V)
    assert jnp.allclose(out32, ref, atol=1e-3, rtol=1e-3), "f32 mismatch vs reference"

    # bf16 production path: bf16 weights/activations/logits, loose check.
    prep16 = prepare_lm_head_params(params, compute_dtype=jnp.bfloat16)
    out16 = bert_lm_prediction_head(hidden_states, prep16, out_dtype=jnp.bfloat16)
    jax.block_until_ready(out16)
    assert out16.shape == (B, S, V)
    assert jnp.allclose(out16.astype(jnp.float32), ref, atol=1e-1, rtol=1e-1), \
        "bf16 mismatch vs reference"

    print("KERNEL_OK")
</pallas_src>

<mosaic_0001>
module attributes {stable_mosaic.version = 11 : i64} {
  func.func @lm_head_kernel(%arg0: i32, %arg1: i32, %arg2: memref<8x32xf32, #tpu.memory_space<vmem>>, %arg3: memref<32x32xf32, #tpu.memory_space<vmem>>, %arg4: memref<1x32xf32, #tpu.memory_space<vmem>>, %arg5: memref<1x32xf32, #tpu.memory_space<vmem>>, %arg6: memref<1x32xf32, #tpu.memory_space<vmem>>, %arg7: memref<32x256xf32, #tpu.memory_space<vmem>>, %arg8: memref<1x256xf32, #tpu.memory_space<vmem>>, %arg9: memref<8x256xf32, #tpu.memory_space<vmem>>, %arg10: memref<8x32xf32, #tpu.memory_space<vmem>>) attributes {dimension_semantics = [#tpu.dimension_semantics<parallel>, #tpu.dimension_semantics<arbitrary>], iteration_bounds = array<i64: 2, 1>, scalar_prefetch = 0 : i64, scratch_operands = 1 : i64, tpu.core_type = #tpu.core_type<tc>, window_params = [{transform_indices = @transform_0, window_bounds = array<i64: 8, 32>}, {pipeline_mode = #tpu.pipeline_mode<synchronous>, transform_indices = @transform_1, window_bounds = array<i64: 32, 32>}, {pipeline_mode = #tpu.pipeline_mode<synchronous>, transform_indices = @transform_2, window_bounds = array<i64: 1, 32>}, {pipeline_mode = #tpu.pipeline_mode<synchronous>, transform_indices = @transform_3, window_bounds = array<i64: 1, 32>}, {pipeline_mode = #tpu.pipeline_mode<synchronous>, transform_indices = @transform_4, window_bounds = array<i64: 1, 32>}, {transform_indices = @transform_5, window_bounds = array<i64: 32, 256>}, {transform_indices = @transform_6, window_bounds = array<i64: 1, 256>}, {transform_indices = @transform_7, window_bounds = array<i64: 8, 256>}]} {
    %c0_i32 = arith.constant 0 : i32
    %0 = arith.cmpi eq, %arg1, %c0_i32 : i32
    %1 = arith.extui %0 : i1 to i32
    %c0_i32_0 = arith.constant 0 : i32
    %2 = arith.cmpi ne, %1, %c0_i32_0 : i32
    scf.if %2 {
      %c0_8 = arith.constant 0 : index
      %c0_9 = arith.constant 0 : index
      %10 = vector.load %arg2[%c0_8, %c0_9] : memref<8x32xf32, #tpu.memory_space<vmem>>, vector<8x32xf32>
      %c0_10 = arith.constant 0 : index
      %c0_11 = arith.constant 0 : index
      %11 = vector.load %arg3[%c0_10, %c0_11] : memref<32x32xf32, #tpu.memory_space<vmem>>, vector<32x32xf32>
      %cst_12 = arith.constant dense<0.000000e+00> : vector<8x32xf32>
      %12 = tpu.matmul %10, %11, %cst_12 {dimension_numbers = #tpu.dot_dimension_numbers<[1], [0], [0], [1], [0, 0, 1, 1], [], []>} : vector<8x32xf32>, vector<32x32xf32>, vector<8x32xf32> -> vector<8x32xf32>
      %c0_13 = arith.constant 0 : index
      %c0_14 = arith.constant 0 : index
      %13 = vector.load %arg4[%c0_13, %c0_14] : memref<1x32xf32, #tpu.memory_space<vmem>>, vector<1x32xf32>
      %14 = vector.broadcast %13 : vector<1x32xf32> to vector<8x32xf32>
      %15 = arith.addf %12, %14 : vector<8x32xf32>
      %cst_15 = arith.constant 5.000000e-01 : f32
      %16 = vector.broadcast %cst_15 : f32 to vector<8x32xf32>
      %17 = arith.mulf %15, %16 : vector<8x32xf32>
      %cst_16 = arith.constant 0.707106769 : f32
      %18 = vector.broadcast %cst_16 : f32 to vector<8x32xf32>
      %19 = arith.mulf %15, %18 : vector<8x32xf32>
      %20 = math.erf %19 : vector<8x32xf32>
      %cst_17 = arith.constant 1.000000e+00 : f32
      %21 = vector.broadcast %cst_17 : f32 to vector<8x32xf32>
      %22 = arith.addf %21, %20 : vector<8x32xf32>
      %23 = arith.mulf %17, %22 : vector<8x32xf32>
      %cst_18 = arith.constant dense<0.000000e+00> : vector<8xf32>
      %24 = vector.multi_reduction <add>, %23, %cst_18 [1] : vector<8x32xf32> to vector<8xf32>
      %25 = vector.shape_cast %24 : vector<8xf32> to vector<8x1xf32>
      %cst_19 = arith.constant 3.200000e+01 : f32
      %26 = vector.broadcast %cst_19 : f32 to vector<8x1xf32>
      %27 = arith.divf %25, %26 : vector<8x1xf32>
      %28 = vector.broadcast %27 : vector<8x1xf32> to vector<8x32xf32>
      %29 = arith.subf %23, %28 : vector<8x32xf32>
      %30 = vector.broadcast %27 : vector<8x1xf32> to vector<8x32xf32>
      %31 = arith.subf %23, %30 : vector<8x32xf32>
      %32 = arith.mulf %29, %31 : vector<8x32xf32>
      %cst_20 = arith.constant dense<0.000000e+00> : vector<8xf32>
      %33 = vector.multi_reduction <add>, %32, %cst_20 [1] : vector<8x32xf32> to vector<8xf32>
      %34 = vector.shape_cast %33 : vector<8xf32> to vector<8x1xf32>
      %cst_21 = arith.constant 3.200000e+01 : f32
      %35 = vector.broadcast %cst_21 : f32 to vector<8x1xf32>
      %36 = arith.divf %34, %35 : vector<8x1xf32>
      %37 = vector.broadcast %27 : vector<8x1xf32> to vector<8x32xf32>
      %38 = arith.subf %23, %37 : vector<8x32xf32>
      %cst_22 = arith.constant 9.99999996E-13 : f32
      %39 = vector.broadcast %cst_22 : f32 to vector<8x1xf32>
      %40 = arith.addf %36, %39 : vector<8x1xf32>
      %41 = math.rsqrt %40 : vector<8x1xf32>
      %42 = vector.broadcast %41 : vector<8x1xf32> to vector<8x32xf32>
      %43 = arith.mulf %38, %42 : vector<8x32xf32>
      %c0_23 = arith.constant 0 : index
      %c0_24 = arith.constant 0 : index
      %44 = vector.load %arg5[%c0_23, %c0_24] : memref<1x32xf32, #tpu.memory_space<vmem>>, vector<1x32xf32>
      %45 = vector.broadcast %44 : vector<1x32xf32> to vector<8x32xf32>
      %46 = arith.mulf %43, %45 : vector<8x32xf32>
      %c0_25 = arith.constant 0 : index
      %c0_26 = arith.constant 0 : index
      %47 = vector.load %arg6[%c0_25, %c0_26] : memref<1x32xf32, #tpu.memory_space<vmem>>, vector<1x32xf32>
      %48 = vector.broadcast %47 : vector<1x32xf32> to vector<8x32xf32>
      %49 = arith.addf %46, %48 : vector<8x32xf32>
      %c0_27 = arith.constant 0 : index
      %c0_28 = arith.constant 0 : index
      %50 = vector.load %arg10[%c0_27, %c0_28] : memref<8x32xf32, #tpu.memory_space<vmem>>, vector<8x32xf32>
      tpu.vector_store %arg10[%c0_27, %c0_28], %49 {strides = array<i32>} : memref<8x32xf32, #tpu.memory_space<vmem>>, vector<8x32xf32>,
    } else {
    }
    %c0 = arith.constant 0 : index
    %c0_1 = arith.constant 0 : index
    %3 = vector.load %arg10[%c0, %c0_1] : memref<8x32xf32, #tpu.memory_space<vmem>>, vector<8x32xf32>
    %c0_2 = arith.constant 0 : index
    %c0_3 = arith.constant 0 : index
    %4 = vector.load %arg7[%c0_2, %c0_3] : memref<32x256xf32, #tpu.memory_space<vmem>>, vector<32x256xf32>
    %cst = arith.constant dense<0.000000e+00> : vector<8x256xf32>
    %5 = tpu.matmul %3, %4, %cst {dimension_numbers = #tpu.dot_dimension_numbers<[1], [0], [0], [1], [0, 0, 1, 1], [], []>} : vector<8x32xf32>, vector<32x256xf32>, vector<8x256xf32> -> vector<8x256xf32>
    %c0_4 = arith.constant 0 : index
    %c0_5 = arith.constant 0 : index
    %6 = vector.load %arg8[%c0_4, %c0_5] : memref<1x256xf32, #tpu.memory_space<vmem>>, vector<1x256xf32>
    %7 = vector.broadcast %6 : vector<1x256xf32> to vector<8x256xf32>
    %8 = arith.addf %5, %7 : vector<8x256xf32>
    %c0_6 = arith.constant 0 : index
    %c0_7 = arith.constant 0 : index
    %9 = vector.load %arg9[%c0_6, %c0_7] : memref<8x256xf32, #tpu.memory_space<vmem>>, vector<8x256xf32>
    tpu.vector_store %arg9[%c0_6, %c0_7], %8 {strides = array<i32>} : memref<8x256xf32, #tpu.memory_space<vmem>>, vector<8x256xf32>,
    return
  }
  func.func @transform_0(%arg0: i32, %arg1: i32) -> (i32, i32) {
    %c0_i32 = arith.constant 0 : i32
    %c0_i32_0 = arith.constant 0 : i32
    return %arg0, %c0_i32 : i32, i32
  }
  func.func @transform_1(%arg0: i32, %arg1: i32) -> (i32, i32) {
    %c0_i32 = arith.constant 0 : i32
    %c0_i32_0 = arith.constant 0 : i32
    %c0_i32_1 = arith.constant 0 : i32
    return %c0_i32, %c0_i32_0 : i32, i32
  }
  func.func @transform_2(%arg0: i32, %arg1: i32) -> (i32, i32) {
    %c0_i32 = arith.constant 0 : i32
    %c0_i32_0 = arith.constant 0 : i32
    %c0_i32_1 = arith.constant 0 : i32
    return %c0_i32, %c0_i32_0 : i32, i32
  }
  func.func @transform_3(%arg0: i32, %arg1: i32) -> (i32, i32) {
    %c0_i32 = arith.constant 0 : i32
    %c0_i32_0 = arith.constant 0 : i32
    %c0_i32_1 = arith.constant 0 : i32
    return %c0_i32, %c0_i32_0 : i32, i32
  }
  func.func @transform_4(%arg0: i32, %arg1: i32) -> (i32, i32) {
    %c0_i32 = arith.constant 0 : i32
    %c0_i32_0 = arith.constant 0 : i32
    %c0_i32_1 = arith.constant 0 : i32
    return %c0_i32, %c0_i32_0 : i32, i32
  }
  func.func @transform_5(%arg0: i32, %arg1: i32) -> (i32, i32) {
    %c0_i32 = arith.constant 0 : i32
    %c0_i32_0 = arith.constant 0 : i32
    return %c0_i32, %arg1 : i32, i32
  }
  func.func @transform_6(%arg0: i32, %arg1: i32) -> (i32, i32) {
    %c0_i32 = arith.constant 0 : i32
    %c0_i32_0 = arith.constant 0 : i32
    return %c0_i32, %arg1 : i32, i32
  }
  func.func @transform_7(%arg0: i32, %arg1: i32) -> (i32, i32) {
    %c0_i32 = arith.constant 0 : i32
    return %arg0, %arg1 : i32, i32
  }
}

</mosaic_0001>

<bundles_post_ra>
// kernel: tpu_custom_call.1
= control target key start
LH: loop header
LB: loop body
LE: loop exit
PB: predicated region body
PF: predicated region fallthrough
CT: control target
= control target key end

     0   :  { %s1350_s0 = inlined_call_operand.hbm [shape: f32[16,32], index: 0, kind: input, shape index: {}]   ;;  %s1351_s1 = inlined_call_operand.hbm [shape: f32[32,32], index: 1, kind: input, shape index: {}]   ;;  %s1352_s2 = inlined_call_operand.vmem [shape: f32[1,32], index: 2, kind: input, shape index: {}]   ;;  %s1353_s3 = inlined_call_operand.hbm [shape: f32[1,32], index: 3, kind: input, shape index: {}]   ;;  %s1354_s4 = inlined_call_operand.hbm [shape: f32[1,32], index: 4, kind: input, shape index: {}]   ;;  %s1355_s5 = inlined_call_operand.hbm [shape: f32[32,256], index: 5, kind: input, shape index: {}]   ;;  %s1356_s6 = inlined_call_operand.vmem [shape: f32[1,256], index: 6, kind: input, shape index: {}]   ;;  %s1357_s7 = inlined_call_operand.hbm [shape: f32[16,256], index: 7, kind: output, shape index: {}]  }
   0x1   :  { %1358 = sst [smem:[#allocation17_spill]] %s1351_s1 }
   0x2   :  { %1359 = sst [smem:[#allocation18_spill]] %s1353_s3 }
   0x3   :  { %12 = vsyncpa [#allocation4], 0 }
   0x4   :  { %14 = vsyncpa [#allocation4 + $0x1], 0 }
   0x5   :  { %15 = vsyncpa [#allocation7], 0 }
   0x6   :  { %16 = vsyncpa [#allocation10], 0 }
   0x7   :  { %17 = vsyncpa [#allocation5], 0 }
   0x8   :  { %19 = vsyncpa [#allocation5 + $0x1], 0  ;;  %s1171_s24 = smov 0   ;;  %s1173_s25 = smov 0  }
   0x9   :  { %s1175_s26 = smov 0   ;;  %s1177_s27 = smov 0  }
   0xa   :  { %s1179_s28 = smov 0   ;;  %s1181_s29 = smov 0  }
   0xb LB: > { %s735_s30 = sadd.s32 4294967295, %s1120_s29   ;;  %p737_p0 = scmp.ge.s32.totalorder %s1120_s29, 1  ;;  %s1120_s29 = sphi %s1181_s29, %s25_s29   ;;  %s1116_s28 = sphi %s1179_s28, %s1372_s28   ;;  %s1112_s27 = sphi %s1177_s27, %s1371_s27   ;;  %s1108_s26 = sphi %s1175_s26, %s1370_s26   ;;  %s1104_s25 = sphi %s1173_s25, %s1369_s25   ;;  %s1100_s24 = sphi %s1171_s24, %s1368_s24  }
   0xc   : > { %p1205_p1 = scmp.eq.s32.totalorder %s735_s30, 0  ;;  %p232_p2 = scmp.lt.s32.totalorder %s1120_s29, 3 }
   0xd   : > { %s1361_s1 = sld [smem:[#allocation17_spill]]  ;;  %s1122_s13 = smov [#allocation6]  }
   0xe   : > { %p1213_p3 = pnand %p737_p0, %p232_p2  ;;  %s245_s14 = sshll.u32 %s1122_s13, 4  ;;  %s246_s14 = int_to_ptr.vmem [resolvable:$true] %s245_s14 }
   0xf   : > { %p743_p6 = scmp.ge.s32.totalorder %s1120_s29, 2  ;;  %s273_s18 = sshll.u32 %s1354_s4, 4  ;;  %s274_s18 = int_to_ptr.hbm [resolvable:$true] %s273_s18 }
  0x10   : > { %p783_p4 = pneg %p1213_p3  ;;  %s1123_s19 = smov 128  }
  0x11   : > { %s1124_s20 = smov 8   ;;  %s1125_s21 = smov [#allocation9]  }
  0x12   : > { %p1221_p5 = pnand %p783_p4, %p1205_p1  ;;  %s275_s22 = sshll.u32 %s1125_s21, 4  ;;  %s276_s22 = int_to_ptr.vmem [resolvable:$true] %s275_s22 }
  0x13   : > { %s243_s11 = sshll.u32 %s1361_s1, 4  ;;  %s1364_s3 = sld [smem:[#allocation18_spill]]  ;;  %s244_s11 = int_to_ptr.hbm [resolvable:$true] %s243_s11 }
  0x14   : > { %786 = dma.hbm_to_vmem [thread:$0]  (!%p1221_p5), %s244_s11, 512, %s246_s14, [#allocation7], %s1123_s19, %s1123_s19, %s1124_s20  }
  0x15   : > { %792 = dma.hbm_to_vmem [thread:$0]  (!%p1221_p5), %s274_s18, 16, %s276_s22, [#allocation10]  }
  0x16   : > { %s287_s17 = sshll.u32 %s1355_s5, 4  ;;  %s1126_s11 = smov [#allocation8]   ;;  %s288_s17 = int_to_ptr.hbm [resolvable:$true] %s287_s17 }
  0x17   : > { %s263_s14 = sshll.u32 %s1126_s11, 4  ;;  %s1127_s19 = smov [#allocation11]   ;;  %s264_s14 = int_to_ptr.vmem [resolvable:$true] %s263_s14 }
  0x18   : > { %s289_s18 = sshll.u32 %s1127_s19, 4  ;;  %s1128_s20 = smov 256   ;;  %s290_s18 = int_to_ptr.vmem [resolvable:$true] %s289_s18 }
  0x19   : > { %s261_s10 = sshll.u32 %s1364_s3, 4  ;;  %s1129_s21 = smov 16   ;;  %s262_s10 = int_to_ptr.hbm [resolvable:$true] %s261_s10 }
  0x1a   : > { %789 = dma.hbm_to_vmem [thread:$0]  (!%p1221_p5), %s262_s10, 16, %s264_s14, [#allocation7]  }
  0x1b   : > { %795 = dma.hbm_to_vmem [thread:$0]  (!%p1221_p5), %s288_s17, 1024, %s290_s18, [#allocation10], %s1128_s20, %s1128_s20, %s1129_s21  }
  0x1c   : > { %s37_s22 = sadd.s32 1, %s1116_s28  ;;  %s736_s23 = sadd.s32 4294967294, %s1120_s29  }
  0x1d   : > { %p39_p7 = scmp.ge.s32.totalorder %s37_s22, 2  ;;  %s44_s9 = sadd.s32 1, %s1108_s26 }
  0x1e   : > { %p51_p8 = scmp.ne.s32.totalorder %s1108_s26, %s1104_s25  ;;  %p52_p9 = scmp.eq.s32.totalorder %s1120_s29, 0 }
  0x1f   : > { %s1374_s22 = smov (%p39_p7, %s37_s22), 0  ;;  %p57_p10 = scmp.ne.s32.totalorder %s1104_s25, %s1100_s24 }
  0x20   : > { %s41_s10 = ssub.s32 %s1116_s28, %s1374_s22  ;;  %p219_p11 = scmp.eq.s32.totalorder %s735_s30, 1 }
  0x21   : > { %p42_p12 = scmp.eq.s32.totalorder %s41_s10, 0  ;;  %p1259_p13 = por %p1205_p1, %p57_p10 }
  0x22   : > { %p1263_p0 = por %p219_p11, %p51_p8  ;;  %p225_p2 = scmp.eq.s32.totalorder %s736_s23, 1 }
  0x23   : > { %s1268_s16 = scalar_select %p42_p12, %s1108_s26, %s44_s9  }
  0x24   : > { %p53_p4 = por %p52_p9, %p51_p8  ;;  %p1270_p5 = por %p225_p2, %p57_p10 }
  0x25   : > { %s311_s11 = sand.u32 1, %s1108_s26   ;;  %s745_s30 = sshll.u32 %s1116_s28, 3 }
  0x26   : > { %p808_p7 = scmp.lt.s32.totalorder %s1120_s29, 2  ;;  %s744_s14 = sshll.u32 %s311_s11, 3 }
  0x27   : > { %s319_s20 = scalar_lea.hbm %s1350_s0, %s745_s30  ;;  %s315_s10 = scalar_lea.vmem [#allocation3], %s744_s14 }
  0x28   : > { %s321_s21 = sshll.u32 %s319_s20, 4  ;;  %s323_s1 = sshll.u32 %s315_s10, 4  ;;  %s322_s21 = int_to_ptr.hbm [resolvable:$true] %s321_s21  ;;  %s324_s1 = int_to_ptr.vmem [resolvable:$true] %s323_s1 }
  0x29   : > { %p797_p11 = pnand %p808_p7, %p53_p4  ;;  %s312_s23 = scalar_lea.sflag [#allocation4], %s311_s11 }
  0x2a   : > { %332 = sbr.rel (%p1213_p3) target bundleno = 652 (0x28c), region = 48  ;;  %s1283_s9 = sand.u32 (!%p1213_p3), 1, %s1104_s25  }
  0x2b   : > { %799 = dma.hbm_to_vmem [thread:$0]  (!%p797_p11), %s322_s21, 128, %s324_s1, %s312_s23  }
  0x2c   : > { %s747_s3 = sshll.u32 (!%p1213_p3), %s1283_s9, 3  ;;  %s335_s19 = scalar_lea.sflag (!%p1213_p3), [#allocation4], %s1283_s9 }
  0x2d   : > { %s338_s30 = scalar_lea.vmem (!%p1213_p3), [#allocation3], %s747_s3 }
  0x2f   : > { %1083 = dma.done.wait (%p1259_p13), %s335_s19, 128  }
  0x30   : > { %1085 = vsyncadd (%p1259_p13), %s335_s19, 4294967168 }
  0x31   : > { %1087 = dma.done.wait (%p1205_p1), [#allocation7], 528  }
  0x32   : > { %1089 = vsyncadd (%p1205_p1), [#allocation7], 4294966768 }
  0x33   : > { %1091 = dma.done.wait (%p1205_p1), [#allocation10], 1040  }
  0x34   : > { %1093 = vsyncadd (%p1205_p1), [#allocation10], 4294966256  ;;  %v409_v0 = vld [vmem:[#allocation6 + $0x18] sm:$0xff]  ;;  %v408_v1 = vld [vmem:[#allocation6 + $0x10] sm:$0xff]  ;;  %vm414_vm0 = vcmask 261120   ;;  %v1130_v48 = vmov 32.0  }
  0x35   : > { %430 = vmatpush.msra.mxu0 %v409_v0  ;;  %v407_v2 = vld [vmem:[#allocation6 + $0x8] sm:$0xff]  ;;  %v406_v3 = vld [vmem:[#allocation6] sm:$0xff]  ;;  %v405_v4 = vld [vmem:[%s338_s30] sm:$0xff]  ;;  %s752_s15 = sshll.u32 %s1283_s9, 4  ;;  %s762_s11 = sshll.u32 %s1112_s27, 4 }
  0x36   : > { %v871_v5 = vld [vmem:[%s1352_s2] ss:$0 sm:$0xff]  ;;  %v529_v60 = vld [vmem:[#allocation11 + $0x30] sm:$0xff]  ;;  %v530_v61 = vld [vmem:[#allocation11 + $0x38] sm:$0xff]  ;;  %s597_s20 = scalar_lea.hbm %s1357_s7, %s762_s11  ;;  %s393_s21 = scalar_lea.vmem [#allocation12], %s752_s15 }
  0x37   : > { %431 = vmatpush.msra.mxu0 %v408_v1  ;;  %v527_v62 = vld [vmem:[#allocation11 + $0x20] sm:$0xff]  ;;  %553 = vmatpush.msra.mxu1 %v529_v60  ;;  %v528_v63 = vld [vmem:[#allocation11 + $0x28] sm:$0xff]  ;;  %v525_v0 = vld [vmem:[#allocation11 + $0x10] sm:$0xff]  ;;  %s599_s10 = sshll.u32 %s393_s21, 4  ;;  %s601_s23 = sshll.u32 %s597_s20, 4  ;;  %s600_s10 = int_to_ptr.vmem [resolvable:$true] %s599_s10  ;;  %s602_s23 = int_to_ptr.hbm [resolvable:$true] %s601_s23 }
  0x38   : > { %573 = vmatpush.msra.mxu2 %v530_v61  ;;  %v526_v1 = vld [vmem:[#allocation11 + $0x18] sm:$0xff]  ;;  %s584_s19 = scalar_lea.sflag [#allocation5], %s1283_s9  ;;  %s1044_s30 = sshra.s32 %s602_s23, 4  ;;  %s1045_s30 = int_to_ptr.hbm [resolvable:$true] %s1044_s30 }
  0x39   : > { %432 = vmatpush.msra.mxu0 %v407_v2  ;;  %554 = vmatpush.msra.mxu1 %v527_v62  ;;  %s1046_s27 = scalar_lea.hbm %s1045_s30, 16  ;;  %s1050_s8 = scalar_lea.hbm %s1357_s7, 32 }
  0x3a   : > { %574 = vmatpush.msra.mxu2 %v528_v63  ;;  %p1047_p1 = scmp.ne.s32.totalorder %s1045_s30, %s1046_s27  ;;  %p1051_p9 = scmp.lt.s32.totalorder %s1045_s30, %s1357_s7 }
  0x3b   : > { %433 = vmatpush.msra.mxu0 %v406_v3  ;;  %555 = vmatpush.msra.mxu1 %v525_v0  ;;  %p1052_p10 = scmp.lt.s32.totalorder %s1050_s8, %s1046_s27 }
  0x3c   : > { %753 = vmatmul.msk.f32.vlgmr.msra.gmra.mxu0 %vm414_vm0, %v405_v4  ;;  %v523_v4 = vld [vmem:[#allocation11] sm:$0xff]  ;;  %575 = vmatpush.msra.mxu2 %v526_v1  ;;  %p1048_p3 = pnand %p1047_p1, %p1263_p0 }
  0x3d   : > { %556 = vmatpush.msra.mxu1 %v523_v4  ;;  %p1053_p12 = por %p1052_p10, %p1051_p9 }
  0x3e   : > { %p1049_p8 = pneg %p1048_p3 }
  0x40   : > { %p1054_p13 = pnand %p1053_p12, %p1049_p8 }
  0xb9   : > { %v435_v6 = vpop.f32.mrf.mxu0 }
  0xba   : > { %v436_v7 = vadd.f32 %v871_v5, %v435_v6  ;;  %v524_v5 = vld [vmem:[#allocation11 + $0x8] sm:$0xff] }
  0xbb   : > { %576 = vmatpush.msra.mxu2 %v524_v5 }
  0xbc   : > { %v439_v8 = vmul.f32 0.70710677, %v436_v7  ;;  %v438_v44 = vmul.f32 0.5, %v436_v7 }
  0xbe   : > { %v440_v9 = vmul.f32 %v439_v8, %v439_v8 }
  0xc0   : > { %v441_v10 = vmin.f32 %v440_v9, 16.0 }
  0xc2   : > { %v442_v11 = vmul.f32 2.1237322e-06, %v441_v10  ;;  %v453_v12 = vmul.f32 3.8918573e-05, %v441_v10 }
  0xc4   : > { %v443_v13 = vadd.f32 0.00028619796, %v442_v11  ;;  %v454_v14 = vadd.f32 0.001143296, %v453_v12 }
  0xc6   : > { %v444_v15 = vmul.f32 %v443_v13, %v441_v10  ;;  %v455_v16 = vmul.f32 %v454_v14, %v441_v10  ;;  %v872_v13 = vld [vmem:[#allocation8] ss:$0 sm:$0xff] }
  0xc8   : > { %v456_v17 = vadd.f32 0.014752088, %v455_v16  ;;  %v445_v18 = vadd.f32 0.0036580483, %v444_v15  ;;  %v873_v15 = vld [vmem:[#allocation9] ss:$0 sm:$0xff] }
  0xca   : > { %v457_v19 = vmul.f32 %v456_v17, %v441_v10  ;;  %v446_v21 = vmul.f32 %v445_v18, %v441_v10 }
  0xcc   : > { %v458_v20 = vadd.f32 0.112945676, %v457_v19  ;;  %v447_v24 = vadd.f32 0.05243302, %v446_v21 }
  0xce   : > { %v459_v22 = vmul.f32 %v458_v20, %v441_v10  ;;  %v448_v27 = vmul.f32 %v447_v24, %v441_v10  ;;  %v531_v20 = vld [vmem:[%s1356_s6] sm:$0x3] }
  0xcf   : > { %v533_v21 = vperm.slane %v531_v20, 0  ;;  %v534_v24 = vperm.slane %v531_v20, 1 }
  0xd0   : > { %v460_v23 = vadd.f32 0.4994258, %v459_v22  ;;  %v449_v28 = vadd.f32 0.18741608, %v448_v27 }
  0xd2   : > { %v461_v25 = vmul.f32 %v460_v23, %v441_v10  ;;  %v450_v30 = vmul.f32 %v449_v28, %v441_v10 }
  0xd4   : > { %v462_v26 = vadd.f32 1.0, %v461_v25  ;;  %v451_v34 = vadd.f32 1.1283791, %v450_v30 }
  0xd6   : > { %874 = vrcp.f32 %v462_v26  ;;  %v474_v33 = vand.u32 2147483648, %v462_v26  ;;  %v472_v36 = vand.u32 2147483647, %v462_v26  ;;  %vm468_vm2 = vweird.f32 %v462_v26 }
  0xd7   : > { %v452_v39 = vmul.f32 %v451_v34, %v439_v8  ;;  %876 = vrcp.f32 %v1130_v48 }
  0xd8   : > { %v475_v38 = vor.u32 1.1754944e-38, %v474_v33  ;;  %vm473_vm4 = vcmp.eq.f32.partialorder %v472_v36, 8.507059e+37 }
  0xdc   : > { %v875_v29 = vpop.eup %874 }
  0xdd   : > { %v464_v31 = vmul.f32 %v875_v29, %v462_v26  ;;  %vm469_vm1 = vweird.f32 %v875_v29  ;;  %v877_v49 = vpop.eup %876 }
  0xde   : > { %vm470_vm3 = vmor %vm468_vm2, %vm469_vm1  ;;  %v486_v50 = vmul.f32 32.0, %v877_v49  ;;  %vm490_vm5 = vweird.f32 %v877_v49 }
  0xdf   : > { %v465_v32 = vsub.f32 1.0, %v464_v31 }
  0xe0   : > { %v487_v51 = vsub.f32 1.0, %v486_v50 }
  0xe1   : > { %v466_v35 = vmul.f32 %v875_v29, %v465_v32 }
  0xe2   : > { %v488_v52 = vmul.f32 %v877_v49, %v487_v51 }
  0xe3   : > { %v467_v37 = vadd.f32 %v875_v29, %v466_v35 }
  0xe4   : > { %v489_v53 = vadd.f32 %v877_v49, %v488_v52 }
  0xe5   : > { %v471_v40 = vsel %vm470_vm3, %v875_v29, %v467_v37 }
  0xe6   : > { %v476_v41 = vsel %vm473_vm4, %v475_v38, %v471_v40  ;;  %v491_v54 = vsel %vm490_vm5, %v877_v49, %v489_v53 }
  0xe7   : > { %v477_v42 = vmul.f32 %v476_v41, %v452_v39 }
  0xe9   : > { %v754_v43 = vclamps-f32 %v477_v42, 1.0 }
  0xeb   : > { %v480_v45 = vadd.f32 1.0, %v754_v43 }
  0xed   : > { %v481_v46 = vmul.f32 %v480_v45, %v438_v44 }
  0xef   : > { %v482_v47 = vsel %vm414_vm0, %v481_v46, 0.0 }
  0xf0   : > { %483 = vadd.xlane.f32.xlu0 %v482_v47 }
 0x163   : > { %v484_v55 = vpop.xlane.xlu0 %483 }
 0x164   : > { %v492_v56 = vmul.f32 %v491_v54, %v484_v55 }
 0x166   : > { %v493_v57 = vsub.f32 %v481_v46, %v492_v56 }
 0x168   : > { %v494_v58 = vmul.f32 %v493_v57, %v493_v57 }
 0x16a   : > { %v495_v59 = vsel %vm414_vm0, %v494_v58, 0.0 }
 0x16b   : > { %496 = vadd.xlane.f32.xlu0 %v495_v59 }
 0x1de   : > { %v497_v2 = vpop.xlane.xlu0 %496 }
 0x1df   : > { %v498_v3 = vmul.f32 %v497_v2, %v491_v54 }
 0x1e1   : > { %v499_v6 = vadd.f32 1e-12, %v498_v3 }
 0x1e3   : > { %878 = vrsqrt.f32 %v499_v6  ;;  %vm506_vm7 = vweird.f32 %v499_v6 }
 0x1e9   : > { %v879_v7 = vpop.eup %878 }
 0x1ea   : > { %v501_v8 = vmul.f32 %v879_v7, %v499_v6  ;;  %vm507_vm6 = vweird.f32 %v879_v7 }
 0x1eb   : > { %vm508_vm8 = vmor %vm506_vm7, %vm507_vm6 }
 0x1ec   : > { %v502_v9 = vmul.f32 %v879_v7, %v501_v8 }
 0x1ee   : > { %v503_v10 = vmul.f32 0.5, %v502_v9 }
 0x1f0   : > { %v504_v11 = vsub.f32 1.5, %v503_v10 }
 0x1f2   : > { %v505_v12 = vmul.f32 %v879_v7, %v504_v11 }
 0x1f4   : > { %v509_v14 = vsel %vm508_vm8, %v879_v7, %v505_v12 }
 0x1f5   : > { %v510_v16 = vmul.f32 %v509_v14, %v493_v57 }
 0x1f7   : > { %v515_v17 = vmul.f32 %v872_v13, %v510_v16 }
 0x1f9   : > { %v520_v18 = vadd.f32 %v873_v15, %v515_v17 }
 0x1fb   : > { %521 = vst.msk [vmem:[#allocation2] sm:$0xff] %vm414_vm0, %v520_v18 }
 0x202   : > { %v522_v19 = vld [vmem:[#allocation2] sm:$0xff] }
 0x203   : > { %755 = vmatmul.msk.f32.vlgmr.msra.gmra.mxu1 %vm414_vm0, %v522_v19  ;;  %756 = vmatmul.msk.f32.vlgmr.msra.gmra.mxu2 %vm414_vm0, %v522_v19 }
 0x280   : > { %v558_v22 = vpop.f32.mrf.mxu1 }
 0x281   : > { %v559_v23 = vadd.f32 %v558_v22, %v533_v21 }
 0x283   : > { %581 = vst [vmem:[%s393_s21] sm:$0xff] %v559_v23 }
 0x286   : > { %v578_v25 = vpop.f32.mrf.mxu2 }
 0x287   : > { %v579_v26 = vadd.f32 %v578_v25, %v534_v24 }
 0x289   : > { %582 = vst [vmem:[%s393_s21 + $0x8] sm:$0xff] %v579_v26 }
 0x28a   : > { %1057 = shalt.err (!%p1054_p13)
}
 0x28b   : > { %781 = dma.vmem_to_hbm [thread:$0]  (%p1263_p0), %s600_s10, 256, %s602_s23, %s584_s19  }
 0x28c PF: > { %s613_s9 = sand.u32 1, %s1100_s24   ;;  %p801_p2 = pnand %p743_p6, %p1270_p5 }
 0x28d   : > { %s614_s11 = scalar_lea.sflag [#allocation5], %s613_s9 }
 0x28e   : > { %p802_p4 = pneg %p801_p2 }
 0x290   : > { %1095 = dma.done.wait (%p802_p4), %s614_s11, 256  }
 0x291   : > { %1097 = vsyncadd (%p802_p4), %s614_s11, 4294967040  ;;  %s25_s29 = sadd.s32 1, %s1120_s29   ;;  %s1368_s24 = smov %s1104_s25 }
 0x292   : > { %p22_p7 = scmp.ge.s32.totalorder %s25_s29, 4   ;;  %s1369_s25 = smov %s1108_s26 }
 0x293   : > { %s1370_s26 = smov %s1268_s16  ;;  %s1371_s27 = smov %s1116_s28 }
 0x294   : > { %s1372_s28 = smov %s1374_s22  ;;  %24 = sbr.rel (!%p22_p7) target bundleno = 11 (0xb), region = 117 }
 0x299   :  { %620 = vsyncpa [#allocation4], 1 }
 0x29a   :  { %622 = vsyncpa [#allocation4 + $0x1], 1 }
 0x29b   :  { %623 = vsyncpa [#allocation7], 1 }
 0x29c   :  { %624 = vsyncpa [#allocation10], 1 }
 0x29d   :  { %625 = vsyncpa [#allocation5], 1 }
 0x29e   :  { %627 = vsyncpa [#allocation5 + $0x1], 1 }

</bundles_post_ra>
